<compile_context>
chip_gen: v7x
topology: tpu7x:2x2x1
jax: 0.10.0
libtpu: 0.0.40
codegen_flags: <defaults>
</compile_context>

<pallas_src>
import functools

import jax
import jax.numpy as jnp
from jax import lax
from jax.experimental import pallas as pl
from jax.experimental.pallas import tpu as pltpu

_VMEM_LIMIT = 32 * 1024 * 1024    # explicit scoped-VMEM limit for pass 2 (OK on v5e/v6e/v7x)
_VMEM_BUDGET = 20 * 1024 * 1024   # planning budget, leaves headroom under the limit


def _pick_row_tile(n, candidates=(1024, 512, 256, 128)):
    # Largest tile that still leaves >= 2 row tiles (v7x megacore shards grid dim 0
    # across its two TensorCores); fall back to the full axis for small / odd n.
    for t in candidates:
        if n % t == 0 and n // t >= 2:
            return t
    return n


def _plan_pass2(n, d, store_bytes):
    """Pick (t_row, t_col) for pass 2.  t_col == n means the key/column operand is
    fully VMEM-resident (fetched once per row tile instead of n/t_row times)."""
    if n % 128 != 0:
        return n, n                          # tiny / irregular: single-tile kernel

    def fits(t_r, t_c):
        key = 2 * t_c * d * store_bytes      # (double-buffered) key/column operand
        qp = 4 * t_r * d * store_bytes       # q + partner tiles, double-buffered
        inter = 3 * t_r * t_c * 4            # sim / exp / partial-sum f32 staging
        acc = t_r * 128 * 4
        return key + qp + inter + acc <= _VMEM_BUDGET

    # Prefer a fully resident key operand (one k-step) when it fits.
    for t_r in (512, 256, 128):
        if n % t_r == 0 and n // t_r >= 2 and fits(t_r, n):
            return t_r, n
    # Otherwise: big row tile for reuse, small streamed column tile.
    # TODO(synk): for very large n, add in-kernel column chunking (pl.ds + fori_loop)
    # over a resident key ref to cut HBM re-streaming further.
    t_row = _pick_row_tile(n, (512, 256, 128))
    t_col = 256 if (n % 256 == 0 and fits(t_row, 256)) else 128
    while t_row > 128 and not fits(t_row, t_col):
        t_row //= 2
    return t_row, t_col


def _normalize_kernel(z_ref, zn_ref, *, inv_sqrt_temp, eps):
    x = z_ref[...].astype(jnp.float32)
    ss = jnp.sum(x * x, axis=-1, keepdims=True)
    # 1 / max(||z||, eps) via rsqrt (EUP slot), with 1/sqrt(temperature) folded in so
    # the Gram matrix zn @ zn.T is directly cos/temperature.
    # NOTE: the reference clamps norm_i*norm_j at eps; we clamp each norm at eps — the
    # behavior only differs for near-zero embedding rows.
    inv = lax.rsqrt(jnp.maximum(ss, eps * eps)) * inv_sqrt_temp
    zn_ref[...] = (x * inv).astype(zn_ref.dtype)


def _ntxent_kernel(q_ref, p_ref, k_ref, loss_ref, acc_ref, *, t_row, t_col, acc_w):
    i = pl.program_id(0)    # row-tile index ("parallel", megacore-shardable)
    kk = pl.program_id(1)   # column-tile index (reduction, last, "arbitrary")

    @pl.when(kk == 0)
    def _init():
        acc_ref[...] = jnp.zeros_like(acc_ref)

    q = q_ref[...]                                                   # (t_row, d)
    # MXU consumes the two row tiles directly (contract last dims): no zn.T in HBM.
    sim = lax.dot_general(q, k_ref[...], (((1,), (1,)), ((), ())),
                          preferred_element_type=jnp.float32)        # (t_row, t_col)

    # Exact self-similarity mask via global indices (valid for any tile geometry).
    r = lax.broadcasted_iota(jnp.int32, sim.shape, 0) + i * t_row
    c = lax.broadcasted_iota(jnp.int32, sim.shape, 1) + kk * t_col
    e = jnp.where(r == c, 0.0, jnp.exp(sim))       # exp stays f32 (v5e EUP is f32-only)

    # Lane-dense accumulation: fold to acc_w (=128) lanes with VPU adds per k-step; the
    # single cross-lane reduction happens at finalize only.
    if acc_w == t_col:
        part = e
    else:
        part = e[:, :128]
        for off in range(128, t_col, 128):
            part = part + e[:, off:off + 128]
    acc_ref[...] += part

    @pl.when(kk == pl.num_programs(1) - 1)
    def _finalize():
        # Single cross-lane reduction + tiny (t_row, 1) store, once per row tile.
        neg = jnp.sum(acc_ref[...], axis=-1, keepdims=True)          # (t_row, 1)
        # Positives: cos(row, partner)/temperature, O(t_row * d) VPU work.
        pos = jnp.sum(q.astype(jnp.float32) * p_ref[...].astype(jnp.float32),
                      axis=-1, keepdims=True)
        loss_ref[...] = (jnp.log(neg) - pos).astype(loss_ref.dtype)


def ntxent_loss(z_i, z_j, *, temperature=0.07, normalize_hidden=False, eps=1e-8,
                store_dtype=jnp.bfloat16, tiles=None):
    # normalize_hidden is a mathematical no-op for cosine similarity; kept for parity.
    del normalize_hidden
    batch = z_i.shape[0]
    z = jnp.concatenate([z_i, z_j], axis=0)
    if z.dtype not in (jnp.float32, jnp.bfloat16):
        z = z.astype(jnp.float32)
    n, d = z.shape
    store_dtype = jnp.dtype(store_dtype)
    inv_sqrt_temp = 1.0 / float(temperature) ** 0.5

    # ---- Pass 1: per-row L2 normalize (+ fold 1/sqrt(temperature)), compact storage. ----
    t1 = _pick_row_tile(n)
    zn = pl.pallas_call(
        functools.partial(_normalize_kernel, inv_sqrt_temp=inv_sqrt_temp, eps=eps),
        out_shape=jax.ShapeDtypeStruct((n, d), store_dtype),
        grid=(n // t1,),
        in_specs=[pl.BlockSpec((t1, d), lambda i: (i, 0))],
        out_specs=pl.BlockSpec((t1, d), lambda i: (i, 0)),
        compiler_params=pltpu.CompilerParams(dimension_semantics=("parallel",)),
    )(z)

    # ---- Pass 2: tiled Gram + online negative-sum + positives. ----
    if tiles is None:
        t_row, t_col = _plan_pass2(n, d, store_dtype.itemsize)
    else:
        t_row, t_col = tiles
    m = n // t_row
    acc_w = 128 if (t_col >= 128 and t_col % 128 == 0) else t_col

    if batch % t_row == 0:
        # Partner rows ((r + batch) mod n) addressed directly from zn: no zp concat,
        # no extra n*d HBM write + read.
        shift = batch // t_row
        partner = zn
        p_spec = pl.BlockSpec((t_row, d), lambda i, k: ((i + shift) % m, 0))
    else:
        partner = jnp.concatenate([zn[batch:], zn[:batch]], axis=0)
        p_spec = pl.BlockSpec((t_row, d), lambda i, k: (i, 0))

    loss_rows = pl.pallas_call(
        functools.partial(_ntxent_kernel, t_row=t_row, t_col=t_col, acc_w=acc_w),
        out_shape=jax.ShapeDtypeStruct((n, 1), jnp.float32),
        grid_spec=pltpu.PrefetchScalarGridSpec(
            num_scalar_prefetch=0,
            grid=(m, n // t_col),
            in_specs=[
                pl.BlockSpec((t_row, d), lambda i, k: (i, 0)),   # q rows (resident over k)
                p_spec,                                          # positive-partner rows
                pl.BlockSpec((t_col, d), lambda i, k: (k, 0)),   # key rows (stream / resident)
            ],
            out_specs=pl.BlockSpec((t_row, 1), lambda i, k: (i, 0)),
            scratch_shapes=[pltpu.VMEM((t_row, acc_w), jnp.float32)],
        ),
        compiler_params=pltpu.CompilerParams(
            dimension_semantics=("parallel", "arbitrary"),
            vmem_limit_bytes=_VMEM_LIMIT),
    )(zn, partner, zn)

    # Mean over 2*batch per-row losses (trivial glue).
    return jnp.sum(loss_rows) * (1.0 / n)


def _reference(z_i, z_j, temperature=0.07):
    # Pure-JAX reference mirroring the PyTorch forward.
    z = jnp.concatenate([z_i, z_j], axis=0)
    b = z_i.shape[0]
    n = 2 * b
    norms = jnp.linalg.norm(z, axis=-1, keepdims=True)
    dots = jnp.matmul(z, z.T, precision=lax.Precision.HIGHEST)
    sim = dots / jnp.maximum(norms * norms.T, 1e-8) / temperature
    pos = jnp.concatenate([jnp.diagonal(sim, b), jnp.diagonal(sim, -b)])
    mask = ~jnp.eye(n, dtype=bool)
    neg_sum = jnp.sum(jnp.exp(sim) * mask, axis=-1)
    return jnp.mean(-(pos - jnp.log(neg_sum)))


if __name__ == "__main__":
    key = jax.random.PRNGKey(0)
    k1, k2, k3, k4 = jax.random.split(key, 4)

    # 1) Tiny shapes consistent with the module (batch=4, hidden=32), f32 storage:
    #    exercises the degenerate single-tile path; tight tolerance vs the reference.
    B, D = 4, 32
    z_i = jax.random.normal(k1, (B, D), dtype=jnp.float32)
    z_j = jax.random.normal(k2, (B, D), dtype=jnp.float32)
    loss = ntxent_loss(z_i, z_j, store_dtype=jnp.float32)
    jax.block_until_ready(loss)
    ref = _reference(z_i, z_j)
    assert jnp.allclose(loss, ref, rtol=1e-4, atol=1e-4), (loss, ref)

    # Default bf16 storage on the same tiny case (looser tolerance: normalized
    # operands are quantized to bf16 before the Gram matmul).
    loss_bf16 = ntxent_loss(z_i, z_j)
    jax.block_until_ready(loss_bf16)
    assert jnp.allclose(loss_bf16, ref, rtol=3e-2, atol=3e-2), (loss_bf16, ref)

    # 2) Resident-key-operand path + index-mapped partner (batch % t_row == 0):
    #    n = 512 -> t_row = 256, t_col = n = 512, grid (2, 1).
    B2, D2 = 256, 64
    z_i2 = jax.random.normal(k3, (B2, D2), dtype=jnp.float32)
    z_j2 = jax.random.normal(k4, (B2, D2), dtype=jnp.float32)
    loss2 = ntxent_loss(z_i2, z_j2)
    jax.block_until_ready(loss2)
    ref2 = _reference(z_i2, z_j2)
    assert jnp.allclose(loss2, ref2, rtol=1e-2, atol=1e-2), (loss2, ref2)

    # 3) Force the streamed/tiled path on the same data (4x4 grid, multi-step
    #    accumulation, global-index diagonal masking across tiles).
    loss3 = ntxent_loss(z_i2, z_j2, tiles=(128, 128))
    jax.block_until_ready(loss3)
    assert jnp.allclose(loss3, ref2, rtol=1e-2, atol=1e-2), (loss3, ref2)

    print("KERNEL_OK")
</pallas_src>

<mosaic_0001>
module attributes {stable_mosaic.version = 11 : i64} {
  func.func @_normalize_kernel(%arg0: i32, %arg1: memref<8x32xf32, #tpu.memory_space<vmem>>, %arg2: memref<8x32xf32, #tpu.memory_space<vmem>>) attributes {dimension_semantics = [#tpu.dimension_semantics<parallel>], iteration_bounds = array<i64: 1>, scalar_prefetch = 0 : i64, scratch_operands = 0 : i64, tpu.core_type = #tpu.core_type<tc>, window_params = [{transform_indices = @transform_0, window_bounds = array<i64: 8, 32>}, {transform_indices = @transform_1, window_bounds = array<i64: 8, 32>}]} {
    %c0 = arith.constant 0 : index
    %c0_0 = arith.constant 0 : index
    %0 = vector.load %arg1[%c0, %c0_0] : memref<8x32xf32, #tpu.memory_space<vmem>>, vector<8x32xf32>
    %1 = arith.mulf %0, %0 : vector<8x32xf32>
    %cst = arith.constant dense<0.000000e+00> : vector<8xf32>
    %2 = vector.multi_reduction <add>, %1, %cst [1] : vector<8x32xf32> to vector<8xf32>
    %3 = vector.shape_cast %2 : vector<8xf32> to vector<8x1xf32>
    %cst_1 = arith.constant 1.000000e-16 : f32
    %4 = vector.broadcast %cst_1 : f32 to vector<8x1xf32>
    %5 = arith.maximumf %3, %4 : vector<8x1xf32>
    %6 = math.rsqrt %5 : vector<8x1xf32>
    %cst_2 = arith.constant 3.77964473 : f32
    %7 = vector.broadcast %cst_2 : f32 to vector<8x1xf32>
    %8 = arith.mulf %6, %7 : vector<8x1xf32>
    %9 = vector.broadcast %8 : vector<8x1xf32> to vector<8x32xf32>
    %10 = arith.mulf %0, %9 : vector<8x32xf32>
    %c0_3 = arith.constant 0 : index
    %c0_4 = arith.constant 0 : index
    %11 = vector.load %arg2[%c0_3, %c0_4] : memref<8x32xf32, #tpu.memory_space<vmem>>, vector<8x32xf32>
    tpu.vector_store %arg2[%c0_3, %c0_4], %10 {strides = array<i32>} : memref<8x32xf32, #tpu.memory_space<vmem>>, vector<8x32xf32>,
    return
  }
  func.func @transform_0(%arg0: i32) -> (i32, i32) {
    %c0_i32 = arith.constant 0 : i32
    %c0_i32_0 = arith.constant 0 : i32
    return %arg0, %c0_i32 : i32, i32
  }
  func.func @transform_1(%arg0: i32) -> (i32, i32) {
    %c0_i32 = arith.constant 0 : i32
    %c0_i32_0 = arith.constant 0 : i32
    return %arg0, %c0_i32 : i32, i32
  }
}

</mosaic_0001>

<bundles_post_ra>
// kernel: tpu_custom_call.1
= control target key start
LH: loop header
LB: loop body
LE: loop exit
PB: predicated region body
PF: predicated region fallthrough
CT: control target
= control target key end

     0   :  { %6 = vsyncpa [#allocation3], 0  ;;  %s135_s0 = inlined_call_operand.hbm [shape: f32[8,32], index: 0, kind: input, shape index: {}]   ;;  %s136_s1 = inlined_call_operand.hbm [shape: f32[8,32], index: 1, kind: output, shape index: {}]  }
   0x1   :  { %7 = vsyncpa [#allocation4], 0  ;;  %s99_s6 = smov [#allocation2]   ;;  %s51_s10 = scalar_lea.hbm %s135_s0, 128 }
   0x2   :  { %s14_s7 = sshll.u32 %s99_s6, 4  ;;  %p52_p0 = scmp.ne.s32.totalorder %s135_s0, %s51_s10  ;;  %s15_s7 = int_to_ptr.vmem [resolvable:$true] %s14_s7 }
   0x3   :  { %p55_p1 = scmp.lt.u32.totalorder %s51_s10, %s135_s0 }
   0x5   :  { %p57_p2 = pnand %p55_p1, %p52_p0 }
   0x7   :  { %60 = shalt.err (!%p57_p2)
}
   0x8   :  { %s61_s15 = scalar_lea.vmem %s15_s7, 128  ;;  %p66_p4 = scmp.lt.s32.totalorder %s15_s7, %s15_s7 }
   0x9   :  { %p62_p3 = scmp.ne.s32.totalorder %s15_s7, %s61_s15  ;;  %p67_p5 = scmp.lt.s32.totalorder %s61_s15, %s61_s15 }
   0xb   :  { %p68_p6 = por %p67_p5, %p66_p4 }
   0xd   :  { %p69_p7 = pnand %p68_p6, %p62_p3 }
   0xf   :  { %72 = shalt.err (!%p69_p7)
}
  0x10   :  { %17 = dma.hbm_to_vmem [thread:$0]  %s135_s0, 128, %s15_s7, [#allocation3]  }
  0x11   :  { %95 = dma.done.wait [#allocation3], 128  }
  0x12   :  { %96 = vsyncadd [#allocation3], 4294967168  ;;  %v21_v0 = vld [vmem:[#allocation2] sm:$0xff]  ;;  %vm23_vm0 = vcmask 261120   ;;  %s100_s18 = smov [#allocation5]  }
  0x13   :  { %v22_v1 = vmul.f32 %v21_v0, %v21_v0  ;;  %s38_s19 = sshll.u32 %s100_s18, 4  ;;  %s39_s19 = int_to_ptr.vmem [resolvable:$true] %s38_s19 }
  0x14   :  { %s73_s20 = scalar_lea.vmem %s39_s19, 128  ;;  %p78_p9 = scmp.lt.s32.totalorder %s39_s19, %s39_s19 }
  0x15   :  { %v24_v2 = vsel %vm23_vm0, %v22_v1, 0.0  ;;  %p74_p8 = scmp.ne.s32.totalorder %s39_s19, %s73_s20  ;;  %p79_p10 = scmp.lt.s32.totalorder %s73_s20, %s73_s20 }
  0x16   :  { %25 = vadd.xlane.f32.xlu0 %v24_v2 }
  0x17   :  { %p80_p11 = por %p79_p10, %p78_p9 }
  0x19   :  { %p81_p12 = pnand %p80_p11, %p74_p8 }
  0xa3   :  { %v26_v3 = vpop.xlane.xlu0 %25 }
  0xa4   :  { %v27_v4 = vmax.f32 %v26_v3, 1e-16 }
  0xa6   :  { %49 = vrsqrt.f32 %v27_v4 }
  0xb0   :  { %v50_v5 = vpop.eup %49 }
  0xb1   :  { %v29_v6 = vmul.f32 3.7796447, %v50_v5 }
  0xb3   :  { %v30_v7 = vmul.f32 %v29_v6, %v21_v0 }
  0xb5   :  { %31 = vst.msk [vmem:[#allocation5] sm:$0xff] %vm23_vm0, %v30_v7 }
  0xb6   :  { %84 = shalt.err (!%p81_p12)
}
  0xb7   :  { %s85_s22 = scalar_lea.hbm %s136_s1, 128 }
  0xb8   :  { %p86_p13 = scmp.ne.s32.totalorder %s136_s1, %s85_s22  ;;  %p89_p0 = scmp.lt.u32.totalorder %s85_s22, %s136_s1 }
  0xba   :  { %p91_p1 = pnand %p89_p0, %p86_p13 }
  0xbc   :  { %94 = shalt.err (!%p91_p1)
}
  0xbd   :  { %41 = dma.vmem_to_hbm [thread:$0]  %s39_s19, 128, %s136_s1, [#allocation4]  }
  0xbe   :  { %97 = dma.done.wait [#allocation4], 128  }
  0xbf   :  { %98 = vsyncadd [#allocation4], 4294967168 }
  0xc0   :  { %45 = vsyncpa [#allocation3], 1 }
  0xc1   :  { %46 = vsyncpa [#allocation4], 1 }

</bundles_post_ra>
